<compile_context>
chip_gen: v7x
topology: tpu7x:2x2x1
jax: 0.10.0
libtpu: 0.0.40
codegen_flags: <defaults>
</compile_context>

<pallas_src>
import functools

import jax
import jax.numpy as jnp
from jax.experimental import pallas as pl
from jax.experimental.pallas import tpu as pltpu


def _round_up(x, m):
    return (x + m - 1) // m * m


def prenet_kernel(x_ref, w1_ref, b1_ref, w2_ref, b2_ref, o_ref):
    """Fused [Linear -> ReLU] x 2 on one row tile of x (f32 accumulation)."""
    x = x_ref[...].astype(w1_ref.dtype)                       # (tm, F_in)
    h = jnp.dot(x, w1_ref[...], preferred_element_type=jnp.float32)
    h = jnp.maximum(h + b1_ref[...], 0.0)                     # bias + ReLU (f32)
    # TODO(synk): dropout is identity at inference (training=False,
    # dropout_at_inference=False); a pltpu.prng_random_bits mask would be
    # applied here (and after the second ReLU) for training mode.
    o = jnp.dot(h.astype(w2_ref.dtype), w2_ref[...],
                preferred_element_type=jnp.float32)
    o = jnp.maximum(o + b2_ref[...], 0.0)                     # bias + ReLU (f32)
    o_ref[...] = o.astype(o_ref.dtype)


@functools.partial(jax.jit, static_argnames=("tm",))
def prenet_forward(x, w1, b1, w2, b2, *, tm=512):
    """x: [B, T, F_in] -> [B, T, F_out]. Eval-mode Prenet (dropout == identity).

    Weights are [in_features, out_features] (transpose of nn.Linear's layout),
    biases are [1, out_features]. bf16 weights (and bf16 x/out) are recommended
    on v6e/v7x; the kernel accumulates in f32 regardless.
    """
    B, T, F_in = x.shape
    F_hidden = w1.shape[1]
    F_out = w2.shape[1]
    M = B * T
    x2d = x.reshape(M, F_in)

    # Sublane granularity for the row tile depends on x's dtype packing.
    sub = 8 if x.dtype.itemsize >= 4 else (16 if x.dtype.itemsize == 2 else 32)
    # Cap tm so the grid has >= ~4 steps (keeps both v7x TensorCores busy and
    # the DMA pipeline fed); never below one sublane group.
    tm_cap = max(sub, _round_up(pl.cdiv(M, 4), sub))
    tm_eff = min(_round_up(tm, sub), tm_cap)
    grid = (pl.cdiv(M, tm_eff),)   # partial last block handled by Pallas

    out = pl.pallas_call(
        prenet_kernel,
        out_shape=jax.ShapeDtypeStruct((M, F_out), x.dtype),
        grid=grid,
        in_specs=[
            pl.BlockSpec((tm_eff, F_in), lambda i: (i, 0)),      # x row tile
            pl.BlockSpec((F_in, F_hidden), lambda i: (0, 0)),    # W1 (resident)
            pl.BlockSpec((1, F_hidden), lambda i: (0, 0)),       # b1 (resident)
            pl.BlockSpec((F_hidden, F_out), lambda i: (0, 0)),   # W2 (resident)
            pl.BlockSpec((1, F_out), lambda i: (0, 0)),          # b2 (resident)
        ],
        out_specs=pl.BlockSpec((tm_eff, F_out), lambda i: (i, 0)),
        compiler_params=pltpu.CompilerParams(
            dimension_semantics=("parallel",)),
        # Note for v5e: only if tm is raised to >=1024 with f32 activations at
        # real prenet widths would vmem_limit_bytes need bumping; default
        # scoped VMEM is ample at tm=512.
    )(x2d, w1, b1, w2, b2)

    return out.reshape(B, T, F_out)


def init_prenet_params(key, in_features, out_features):
    """Deterministic init mimicking nn.Linear (uniform +-1/sqrt(fan_in))."""
    params = []
    in_sizes = [in_features] + list(out_features[:-1])
    for in_size, out_size in zip(in_sizes, out_features):
        key, kw, kb = jax.random.split(key, 3)
        bound = 1.0 / (in_size ** 0.5)
        w = jax.random.uniform(kw, (in_size, out_size), jnp.float32,
                               minval=-bound, maxval=bound)
        b = jax.random.uniform(kb, (1, out_size), jnp.float32,
                               minval=-bound, maxval=bound)
        params.append((w, b))
    return params


def prenet_reference(x, params):
    """Pure-JAX reference of the eval-mode PyTorch forward."""
    B, T, _ = x.shape
    h = x.reshape(B * T, -1).astype(jnp.float32)
    for w, b in params:
        h = jnp.maximum(h @ w.astype(jnp.float32) + b, 0.0)
    return h.reshape(B, T, -1)


if __name__ == "__main__":
    key = jax.random.PRNGKey(0)
    k_x, k_p, k_x2 = jax.random.split(key, 3)

    # Small shapes consistent with the module: batch=2, seq=8, features=32,
    # out_features=[32, 32] (two prenet blocks).
    B, T, F_IN = 2, 8, 32
    OUT_FEATURES = [32, 32]

    x = jax.random.normal(k_x, (B, T, F_IN), dtype=jnp.float32)
    params = init_prenet_params(k_p, F_IN, OUT_FEATURES)
    (w1, b1), (w2, b2) = params

    # f32 weights: bitwise-close to the pure-JAX reference.
    out = jax.block_until_ready(prenet_forward(x, w1, b1, w2, b2))
    ref = prenet_reference(x, params)
    assert out.shape == (B, T, OUT_FEATURES[-1])
    assert jnp.allclose(out, ref, atol=1e-5, rtol=1e-5), "f32 mismatch vs reference"

    # Larger, non-divisible row count exercising the cdiv grid with a partial
    # last block (M = 400, tm capped to 104 -> grid of 4).
    B2, T2 = 4, 100
    x2 = jax.random.normal(k_x2, (B2, T2, F_IN), dtype=jnp.float32)
    out2 = jax.block_until_ready(prenet_forward(x2, w1, b1, w2, b2))
    ref2 = prenet_reference(x2, params)
    assert out2.shape == (B2, T2, OUT_FEATURES[-1])
    assert jnp.allclose(out2, ref2, atol=1e-5, rtol=1e-5), "partial-block mismatch"

    # bf16 end-to-end (recommended on v6e/v7x): bf16 x, weights, and output;
    # bias add, ReLU and MXU accumulation remain f32 in-kernel.
    out_bf16 = jax.block_until_ready(
        prenet_forward(x2.astype(jnp.bfloat16),
                       w1.astype(jnp.bfloat16), b1,
                       w2.astype(jnp.bfloat16), b2))
    assert out_bf16.dtype == jnp.bfloat16
    assert out_bf16.shape == (B2, T2, OUT_FEATURES[-1])
    assert jnp.allclose(out_bf16.astype(jnp.float32), ref2,
                        atol=5e-2, rtol=5e-2), "bf16 mismatch"

    print("KERNEL_OK")
</pallas_src>

<mosaic_0001>
module attributes {stable_mosaic.version = 11 : i64} {
  func.func @prenet_kernel(%arg0: i32, %arg1: memref<8x32xf32, #tpu.memory_space<vmem>>, %arg2: memref<32x32xf32, #tpu.memory_space<vmem>>, %arg3: memref<1x32xf32, #tpu.memory_space<vmem>>, %arg4: memref<32x32xf32, #tpu.memory_space<vmem>>, %arg5: memref<1x32xf32, #tpu.memory_space<vmem>>, %arg6: memref<8x32xf32, #tpu.memory_space<vmem>>) attributes {dimension_semantics = [#tpu.dimension_semantics<parallel>], iteration_bounds = array<i64: 2>, scalar_prefetch = 0 : i64, scratch_operands = 0 : i64, tpu.core_type = #tpu.core_type<tc>, window_params = [{transform_indices = @transform_0, window_bounds = array<i64: 8, 32>}, {pipeline_mode = #tpu.pipeline_mode<synchronous>, transform_indices = @transform_1, window_bounds = array<i64: 32, 32>}, {pipeline_mode = #tpu.pipeline_mode<synchronous>, transform_indices = @transform_2, window_bounds = array<i64: 1, 32>}, {pipeline_mode = #tpu.pipeline_mode<synchronous>, transform_indices = @transform_3, window_bounds = array<i64: 32, 32>}, {pipeline_mode = #tpu.pipeline_mode<synchronous>, transform_indices = @transform_4, window_bounds = array<i64: 1, 32>}, {transform_indices = @transform_5, window_bounds = array<i64: 8, 32>}]} {
    %c0 = arith.constant 0 : index
    %c0_0 = arith.constant 0 : index
    %0 = vector.load %arg1[%c0, %c0_0] : memref<8x32xf32, #tpu.memory_space<vmem>>, vector<8x32xf32>
    %c0_1 = arith.constant 0 : index
    %c0_2 = arith.constant 0 : index
    %1 = vector.load %arg2[%c0_1, %c0_2] : memref<32x32xf32, #tpu.memory_space<vmem>>, vector<32x32xf32>
    %cst = arith.constant dense<0.000000e+00> : vector<8x32xf32>
    %2 = tpu.matmul %0, %1, %cst {dimension_numbers = #tpu.dot_dimension_numbers<[1], [0], [0], [1], [0, 0, 1, 1], [], []>} : vector<8x32xf32>, vector<32x32xf32>, vector<8x32xf32> -> vector<8x32xf32>
    %c0_3 = arith.constant 0 : index
    %c0_4 = arith.constant 0 : index
    %3 = vector.load %arg3[%c0_3, %c0_4] : memref<1x32xf32, #tpu.memory_space<vmem>>, vector<1x32xf32>
    %4 = vector.broadcast %3 : vector<1x32xf32> to vector<8x32xf32>
    %5 = arith.addf %2, %4 : vector<8x32xf32>
    %cst_5 = arith.constant 0.000000e+00 : f32
    %6 = vector.broadcast %cst_5 : f32 to vector<8x32xf32>
    %7 = arith.maximumf %5, %6 : vector<8x32xf32>
    %c0_6 = arith.constant 0 : index
    %c0_7 = arith.constant 0 : index
    %8 = vector.load %arg4[%c0_6, %c0_7] : memref<32x32xf32, #tpu.memory_space<vmem>>, vector<32x32xf32>
    %cst_8 = arith.constant dense<0.000000e+00> : vector<8x32xf32>
    %9 = tpu.matmul %7, %8, %cst_8 {dimension_numbers = #tpu.dot_dimension_numbers<[1], [0], [0], [1], [0, 0, 1, 1], [], []>} : vector<8x32xf32>, vector<32x32xf32>, vector<8x32xf32> -> vector<8x32xf32>
    %c0_9 = arith.constant 0 : index
    %c0_10 = arith.constant 0 : index
    %10 = vector.load %arg5[%c0_9, %c0_10] : memref<1x32xf32, #tpu.memory_space<vmem>>, vector<1x32xf32>
    %11 = vector.broadcast %10 : vector<1x32xf32> to vector<8x32xf32>
    %12 = arith.addf %9, %11 : vector<8x32xf32>
    %cst_11 = arith.constant 0.000000e+00 : f32
    %13 = vector.broadcast %cst_11 : f32 to vector<8x32xf32>
    %14 = arith.maximumf %12, %13 : vector<8x32xf32>
    %c0_12 = arith.constant 0 : index
    %c0_13 = arith.constant 0 : index
    %15 = vector.load %arg6[%c0_12, %c0_13] : memref<8x32xf32, #tpu.memory_space<vmem>>, vector<8x32xf32>
    tpu.vector_store %arg6[%c0_12, %c0_13], %14 {strides = array<i32>} : memref<8x32xf32, #tpu.memory_space<vmem>>, vector<8x32xf32>,
    return
  }
  func.func @transform_0(%arg0: i32) -> (i32, i32) {
    %c0_i32 = arith.constant 0 : i32
    %c0_i32_0 = arith.constant 0 : i32
    return %arg0, %c0_i32 : i32, i32
  }
  func.func @transform_1(%arg0: i32) -> (i32, i32) {
    %c0_i32 = arith.constant 0 : i32
    %c0_i32_0 = arith.constant 0 : i32
    %c0_i32_1 = arith.constant 0 : i32
    return %c0_i32, %c0_i32_0 : i32, i32
  }
  func.func @transform_2(%arg0: i32) -> (i32, i32) {
    %c0_i32 = arith.constant 0 : i32
    %c0_i32_0 = arith.constant 0 : i32
    %c0_i32_1 = arith.constant 0 : i32
    return %c0_i32, %c0_i32_0 : i32, i32
  }
  func.func @transform_3(%arg0: i32) -> (i32, i32) {
    %c0_i32 = arith.constant 0 : i32
    %c0_i32_0 = arith.constant 0 : i32
    %c0_i32_1 = arith.constant 0 : i32
    return %c0_i32, %c0_i32_0 : i32, i32
  }
  func.func @transform_4(%arg0: i32) -> (i32, i32) {
    %c0_i32 = arith.constant 0 : i32
    %c0_i32_0 = arith.constant 0 : i32
    %c0_i32_1 = arith.constant 0 : i32
    return %c0_i32, %c0_i32_0 : i32, i32
  }
  func.func @transform_5(%arg0: i32) -> (i32, i32) {
    %c0_i32 = arith.constant 0 : i32
    %c0_i32_0 = arith.constant 0 : i32
    return %arg0, %c0_i32 : i32, i32
  }
}

</mosaic_0001>

<bundles_post_ra>
// kernel: prenet_forward.1
= control target key start
LH: loop header
LB: loop body
LE: loop exit
PB: predicated region body
PF: predicated region fallthrough
CT: control target
= control target key end

     0   :  { %10 = vsyncpa [#allocation3], 0  ;;  %s1120_s0 = inlined_call_operand.hbm [shape: f32[16,32], index: 0, kind: input, shape index: {}]   ;;  %s1121_s1 = inlined_call_operand.hbm [shape: f32[32,32], index: 1, kind: input, shape index: {}]   ;;  %s1122_s2 = inlined_call_operand.vmem [shape: f32[1,32], index: 2, kind: input, shape index: {}]   ;;  %s1123_s3 = inlined_call_operand.hbm [shape: f32[32,32], index: 3, kind: input, shape index: {}]   ;;  %s1124_s4 = inlined_call_operand.vmem [shape: f32[1,32], index: 4, kind: input, shape index: {}]   ;;  %s1125_s5 = inlined_call_operand.hbm [shape: f32[16,32], index: 5, kind: output, shape index: {}]  }
   0x1   :  { %12 = vsyncpa [#allocation3 + $0x1], 0 }
   0x2   :  { %13 = vsyncpa [#allocation6], 0 }
   0x3   :  { %14 = vsyncpa [#allocation4], 0 }
   0x4   :  { %16 = vsyncpa [#allocation4 + $0x1], 0  ;;  %s878_s18 = smov 0   ;;  %s880_s19 = smov 0  }
   0x5   :  { %s882_s20 = smov 0   ;;  %s884_s21 = smov 0  }
   0x6 LB: > { %s899_s22 = sadd.s32 4294967295, %s837_s21   ;;  %s545_s23 = sadd.s32 4294967294, %s837_s21   ;;  %s837_s21 = sphi %s884_s21, %s1145_s21   ;;  %s833_s20 = sphi %s882_s20, %s1144_s20   ;;  %s829_s19 = sphi %s880_s19, %s1143_s19   ;;  %s825_s18 = sphi %s878_s18, %s1142_s18  }
   0x7   : > { %p42_p0 = scmp.ne.s32.totalorder %s829_s19, %s825_s18  ;;  %p1126_p1 = scmp.eq.s32.totalorder %s899_s22, 0 }
   0x8   : > { %p156_p3 = scmp.eq.s32.totalorder %s545_s23, 1  ;;  %p546_p5 = scmp.ge.s32.totalorder %s837_s21, 1 }
   0x9   : > { %p908_p4 = por %p1126_p1, %p42_p0  ;;  %p163_p7 = scmp.lt.s32.totalorder %s837_s21, 3 }
   0xa   : > { %p913_p6 = por %p156_p3, %p42_p0  ;;  %s839_s27 = smov [#allocation5]  }
   0xb   : > { %s1129_s24 = scalar_select %p908_p4, 1, 0 }
   0xc   : > { %s1130_s25 = scalar_select %p913_p6, 1, 0 }
   0xd   : > { %p918_p8 = pnand %p546_p5, %p163_p7  ;;  %s175_s28 = sshll.u32 %s839_s27, 4  ;;  %s922_s28 = int_to_ptr.vmem [resolvable:$true] %s175_s28 }
   0xe   : > { %s840_s30 = smov [#allocation7]   ;;  %s681_s9 = scalar_lea.hbm %s1121_s1, 512 }
   0xf   : > { %p621_p9 = pneg %p918_p8  ;;  %s191_s6 = sshll.u32 %s840_s30, 4  ;;  %s933_s6 = int_to_ptr.vmem [resolvable:$true] %s191_s6 }
  0x10   : > { %p682_p12 = scmp.ne.s32.totalorder %s1121_s1, %s681_s9  ;;  %p688_p5 = scmp.lt.u32.totalorder %s681_s9, %s1121_s1 }
  0x11   : > { %p929_p11 = pnand %p621_p9, %p1126_p1 }
  0x13   : > { %p683_p13 = pneg %p929_p11 }
  0x15   : > { %p684_p0 = pnand %p683_p13, %p682_p12 }
  0x17   : > { %p685_p3 = pneg %p684_p0 }
  0x19   : > { %p690_p7 = pnand %p688_p5, %p685_p3 }
  0x1b   : > { %693 = shalt.err (!%p690_p7)
}
  0x1c   : > { %s694_s14 = scalar_lea.vmem %s922_s28, 512  ;;  %p702_p2 = scmp.lt.s32.totalorder %s922_s28, %s922_s28 }
  0x1d   : > { %p695_p9 = scmp.ne.s32.totalorder %s922_s28, %s694_s14  ;;  %p703_p12 = scmp.lt.s32.totalorder %s694_s14, %s694_s14 }
  0x1f   : > { %p697_p10 = pnand %p695_p9, %p683_p13  ;;  %p704_p0 = por %p703_p12, %p702_p2 }
  0x21   : > { %p698_p1 = pneg %p697_p10 }
  0x23   : > { %p705_p6 = pnand %p704_p0, %p698_p1 }
  0x25   : > { %708 = shalt.err (!%p705_p6)
}
  0x26   : > { %s841_s15 = smov 128   ;;  %s842_s16 = smov 8  }
  0x27   : > { %624 = dma.hbm_to_vmem [thread:$0]  (!%p929_p11), %s1121_s1, 512, %s922_s28, [#allocation6], %s841_s15, %s841_s15, %s842_s16  }
  0x28   : > { %s709_s7 = scalar_lea.hbm %s1123_s3, 512 }
  0x29   : > { %p710_p2 = scmp.ne.s32.totalorder %s1123_s3, %s709_s7  ;;  %p716_p10 = scmp.lt.u32.totalorder %s709_s7, %s1123_s3 }
  0x2b   : > { %p712_p1 = pnand %p710_p2, %p683_p13 }
  0x2d   : > { %p713_p6 = pneg %p712_p1 }
  0x2f   : > { %p718_p3 = pnand %p716_p10, %p713_p6 }
  0x31   : > { %721 = shalt.err (!%p718_p3)
}
  0x32   : > { %s722_s28 = scalar_lea.vmem %s933_s6, 512  ;;  %p730_p12 = scmp.lt.s32.totalorder %s933_s6, %s933_s6 }
  0x33   : > { %p723_p5 = scmp.ne.s32.totalorder %s933_s6, %s722_s28  ;;  %p731_p0 = scmp.lt.s32.totalorder %s722_s28, %s722_s28 }
  0x35   : > { %p725_p7 = pnand %p723_p5, %p683_p13  ;;  %p732_p2 = por %p731_p0, %p730_p12 }
  0x37   : > { %p726_p9 = pneg %p725_p7 }
  0x39   : > { %p733_p1 = pnand %p732_p2, %p726_p9 }
  0x3b   : > { %736 = shalt.err (!%p733_p1)
}
  0x3c   : > { %627 = dma.hbm_to_vmem [thread:$0]  (!%p929_p11), %s1123_s3, 512, %s933_s6, [#allocation6], %s841_s15, %s841_s15, %s842_s16  }
  0x3d   : > { %s988_s14 = sadd.s32 1, %s837_s21   ;;  %s29_s29 = sadd.s32 1, %s833_s20 }
  0x3e   : > { %s26_s17 = ssub.s32 %s837_s21, %s988_s14  ;;  %p36_p13 = scmp.ne.s32.totalorder %s833_s20, %s829_s19 }
  0x3f   : > { %p27_p6 = scmp.eq.s32.totalorder %s26_s17, 0  ;;  %p37_p10 = scmp.eq.s32.totalorder %s837_s21, 0 }
  0x40   : > { %p1133_p3 = scmp.eq.s32.totalorder %s899_s22, 1  ;;  %p638_p7 = scmp.lt.s32.totalorder %s837_s21, 2 }
  0x41   : > { %s1004_s27 = scalar_select %p27_p6, %s833_s20, %s29_s29  }
  0x42   : > { %p998_p5 = por %p1133_p3, %p36_p13  ;;  %p38_p9 = por %p37_p10, %p36_p13 }
  0x43   : > { %s208_s30 = sand.u32 1, %s833_s20   ;;  %s551_s6 = sshll.u32 %s837_s21, 7 }
  0x44   : > { %s1134_s23 = scalar_select %p998_p5, 1, 0 }
  0x45   : > { %s550_s7 = sshll.u32 %s208_s30, 3  ;;  %s1011_s8 = scalar_lea.hbm %s1120_s0, %s551_s6 }
  0x46   : > { %s212_s9 = scalar_lea.vmem [#allocation2], %s550_s7  ;;  %p1015_p11 = pnand %p638_p7, %p38_p9 }
  0x47   : > { %s219_s10 = sshll.u32 %s212_s9, 4  ;;  %s209_s28 = scalar_lea.sflag [#allocation3], %s208_s30  ;;  %s1013_s10 = int_to_ptr.vmem [resolvable:$true] %s219_s10 }
  0x48   : > { %s737_s12 = scalar_lea.hbm %s1011_s8, 128  ;;  %p739_p0 = pneg %p1015_p11 }
  0x49   : > { %p738_p12 = scmp.ne.s32.totalorder %s1011_s8, %s737_s12  ;;  %s742_s17 = scalar_lea.hbm %s1120_s0, 256 }
  0x4a   : > { %p743_p13 = scmp.lt.u32.totalorder %s1011_s8, %s1120_s0  ;;  %p744_p6 = scmp.lt.u32.totalorder %s742_s17, %s737_s12 }
  0x4b   : > { %p740_p2 = pnand %p739_p0, %p738_p12  ;;  %p746_p3 = scmp.lt.u32.totalorder %s737_s12, %s1011_s8 }
  0x4c   : > { %p745_p10 = por %p744_p6, %p743_p13 }
  0x4d   : > { %p741_p1 = pneg %p740_p2 }
  0x4e   : > { %p747_p7 = por %p746_p3, %p745_p10 }
  0x50   : > { %p748_p9 = pnand %p747_p7, %p741_p1 }
  0x52   : > { %751 = shalt.err (!%p748_p9)
}
  0x53   : > { %s752_s30 = scalar_lea.vmem %s1013_s10, 128  ;;  %s843_s15 = smov [#allocation2]  }
  0x54   : > { %p753_p12 = scmp.ne.s32.totalorder %s1013_s10, %s752_s30  ;;  %s757_s16 = sshll.u32 %s843_s15, 4  ;;  %s758_s16 = int_to_ptr.vmem [resolvable:$false] %s757_s16 }
  0x55   : > { %s759_s9 = scalar_lea.vmem %s758_s16, 256  ;;  %p760_p4 = scmp.lt.s32.totalorder %s1013_s10, %s758_s16 }
  0x56   : > { %p755_p2 = pnand %p753_p12, %p739_p0  ;;  %p761_p13 = scmp.lt.s32.totalorder %s759_s9, %s752_s30 }
  0x58   : > { %p756_p5 = pneg %p755_p2  ;;  %p762_p6 = por %p761_p13, %p760_p4 }
  0x5a   : > { %p763_p10 = pnand %p762_p6, %p756_p5 }
  0x5c   : > { %766 = shalt.err (!%p763_p10)
}
  0x5d   : > { %631 = dma.hbm_to_vmem [thread:$0]  (!%p1015_p11), %s1011_s8, 128, %s1013_s10, %s209_s28  }
  0x5e   : > { %228 = sbr.rel (%p918_p8) target bundleno = 561 (0x231), region = 40  ;;  %s1047_s12 = sand.u32 (!%p918_p8), 1, %s829_s19  }
  0x5f   : > { %s553_s13 = sshll.u32 (!%p918_p8), %s1047_s12, 3  ;;  %s231_s29 = scalar_lea.sflag (!%p918_p8), [#allocation3], %s1047_s12 }
  0x60   : > { %s234_s17 = scalar_lea.vmem (!%p918_p8), [#allocation2], %s553_s13  ;;  %p1136_p4 = scmp.ne.s32.totalorder (!%p918_p8), %s1129_s24, 0 }
  0x65   : > { %812 = dma.done.wait (%p1136_p4), %s231_s29, 128  }
  0x66   : > { %814 = vsyncadd (%p1136_p4), %s231_s29, 4294967168  ;;  %p1137_p5 = scmp.eq.s32.totalorder %s899_s22, 0 }
  0x68   : > { %816 = dma.done.wait (%p1137_p5), [#allocation6], 1024   ;;  %p1138_p8 = pmov %p1137_p5 }
  0x69   : > { %v844_v0 = vmov 0.0|0.0   ;;  %vm845_vm0 = vmmov 0   ;;  %v846_v1 = vmov 0.0   ;;  %v270_v2 = vld [vmem:[#allocation5] sm:$0xff]  ;;  %v271_v3 = vld [vmem:[#allocation5 + $0x8] sm:$0xff]  ;;  %v272_v4 = vld [vmem:[#allocation5 + $0x10] sm:$0xff] }
  0x6a   : > { %818 = vsyncadd (%p1138_p8), [#allocation6], 4294966272  ;;  %597 = vmatprep.subr.bf16.mxu0 %v844_v0  ;;  %583 = vmatprep.mubr.msk.f32.mxu0 %vm845_vm0, %v846_v1  ;;  %v598_v5 = vpack.c.bf16 %v271_v3, %v270_v2  ;;  %v273_v6 = vld [vmem:[#allocation5 + $0x18] sm:$0xff]  ;;  %v356_v7 = vld [vmem:[#allocation7] sm:$0xff]  ;;  %vm281_vm1 = vcmask 261120   ;;  %s562_s11 = sshll.u32 %s899_s22, 7 }
  0x6b   : > { %603 = vmatprep.subr.bf16.mxu1 %v844_v0  ;;  %594 = vmatprep.mubr.msk.f32.mxu1 %vm845_vm0, %v846_v1  ;;  %v357_v8 = vld [vmem:[#allocation7 + $0x8] sm:$0xff]  ;;  %v601_v9 = vpack.c.bf16 %v273_v6, %v272_v4  ;;  %v269_v11 = vld [vmem:[%s234_s17] sm:$0xff]  ;;  %s268_s28 = scalar_lea.vmem [#allocation8], %s553_s13  ;;  %s1075_s15 = scalar_lea.hbm %s1125_s5, %s562_s11 }
  0x6c   : > { %599 = vmatpush3.bf16.msra.mxu0 %v598_v5  ;;  %v604_v10 = vpack.c.bf16 %v357_v8, %v356_v7  ;;  %v358_v12 = vld [vmem:[#allocation7 + $0x10] sm:$0xff]  ;;  %v359_v13 = vld [vmem:[#allocation7 + $0x18] sm:$0xff]  ;;  %s456_s7 = sshll.u32 %s268_s28, 4  ;;  %s443_s16 = scalar_lea.sflag [#allocation4], %s1047_s12  ;;  %s1077_s7 = int_to_ptr.vmem [resolvable:$true] %s456_s7 }
  0x6d   : > { %600 = vmatprep.subr.bf16.mxu0 %v844_v0  ;;  %v607_v14 = vpack.c.bf16 %v359_v13, %v358_v12  ;;  %v557_v15 = vld [vmem:[%s1122_s2] ss:$0 sm:$0xff]  ;;  %s767_s22 = scalar_lea.vmem %s1077_s7, 128  ;;  %p1139_p0 = scmp.ne.s32.totalorder %s1134_s23, 0 }
  0x6e   : > { %605 = vmatpush3.bf16.msra.mxu1 %v604_v10  ;;  %v559_v20 = vld [vmem:[%s1124_s4] ss:$0 sm:$0xff]  ;;  %p768_p11 = scmp.ne.s32.totalorder %s1077_s7, %s767_s22  ;;  %s847_s9 = smov [#allocation8]  }
  0x6f   : > { %606 = vmatprep.subr.bf16.mxu1 %v844_v0  ;;  %s771_s13 = sshll.u32 %s847_s9, 4  ;;  %s772_s13 = int_to_ptr.vmem [resolvable:$false] %s771_s13 }
  0x70   : > { %602 = vmatpush3.bf16.msra.mxu0 %v601_v9  ;;  %p769_p1 = pnand %p768_p11, %p1139_p0  ;;  %s773_s29 = scalar_lea.vmem %s772_s13, 256 }
  0x71   : > { %p774_p7 = scmp.lt.s32.totalorder %s1077_s7, %s772_s13  ;;  %p775_p9 = scmp.lt.s32.totalorder %s773_s29, %s767_s22 }
  0x72   : > { %608 = vmatpush3.bf16.msra.mxu1 %v607_v14  ;;  %p770_p3 = pneg %p769_p1 }
  0x73   : > { %584 = vmatmul.mubr.msk.f32.vlgmr.msra.gmra.mrb[0].mxu0 %vm281_vm1, %v269_v11  ;;  %p776_p12 = por %p775_p9, %p774_p7 }
  0x75   : > { %p777_p2 = pnand %p776_p12, %p770_p3 }
 0x146   : > { %v351_v16 = vpop.f32.mrb[0].mxu0 }
 0x147   : > { %v352_v17 = vadd.f32 %v557_v15, %v351_v16  ;;  %v585_v18 = vpop.f32.mrb[1].mxu0 }
 0x149   : > { %v355_v19 = vmax.f32 %v352_v17, 0.0 }
 0x14b   : > { %595 = vmatmul.mubr.msk.f32.vlgmr.msra.gmra.mrb[0].mxu1 %vm281_vm1, %v355_v19 }
 0x21e   : > { %v436_v21 = vpop.f32.mrb[0].mxu1 }
 0x21f   : > { %v437_v22 = vadd.f32 %v559_v20, %v436_v21  ;;  %v596_v23 = vpop.f32.mrb[1].mxu1 }
 0x221   : > { %v440_v24 = vmax.f32 %v437_v22, 0.0 }
 0x223   : > { %441 = vst.msk [vmem:[%s268_s28] sm:$0xff] %vm281_vm1, %v440_v24 }
 0x224   : > { %780 = shalt.err (!%p777_p2)
}
 0x225   : > { %s781_s12 = scalar_lea.hbm %s1075_s15, 128  ;;  %s785_s26 = scalar_lea.hbm %s1125_s5, 256 }
 0x226   : > { %p782_p13 = scmp.ne.s32.totalorder %s1075_s15, %s781_s12  ;;  %p786_p4 = scmp.lt.u32.totalorder %s1075_s15, %s1125_s5 }
 0x227   : > { %p787_p5 = scmp.lt.u32.totalorder %s785_s26, %s781_s12  ;;  %p789_p11 = scmp.lt.u32.totalorder %s781_s12, %s1075_s15 }
 0x228   : > { %p783_p6 = pnand %p782_p13, %p1139_p0 }
 0x229   : > { %p788_p8 = por %p787_p5, %p786_p4 }
 0x22a   : > { %p784_p10 = pneg %p783_p6 }
 0x22b   : > { %p790_p1 = por %p789_p11, %p788_p8 }
 0x22d   : > { %p791_p3 = pnand %p790_p1, %p784_p10 }
 0x22f   : > { %794 = shalt.err (!%p791_p3)
}
 0x230   : > { %619 = dma.vmem_to_hbm [thread:$0]  (%p1139_p0), %s1077_s7, 128, %s1075_s15, %s443_s16  }
 0x231 PF: > { %s468_s11 = sand.u32 1, %s825_s18   ;;  %p1140_p7 = scmp.ne.s32.totalorder %s1130_s25, 0 }
 0x232   : > { %p1141_p9 = scmp.ge.s32.totalorder %s837_s21, 2  ;;  %s469_s28 = scalar_lea.sflag [#allocation4], %s468_s11 }
 0x234   : > { %p633_p12 = pnand %p1141_p9, %p1140_p7 }
 0x236   : > { %820 = dma.done.wait (!%p633_p12), %s469_s28, 128  }
 0x237   : > { %822 = vsyncadd (!%p633_p12), %s469_s28, 4294967168  ;;  %p19_p2 = scmp.ge.s32.totalorder %s988_s14, 4   ;;  %s1142_s18 = smov %s829_s19 }
 0x238   : > { %s1143_s19 = smov %s833_s20  ;;  %s1144_s20 = smov %s1004_s27 }
 0x239   : > { %s1145_s21 = smov %s988_s14  ;;  %21 = sbr.rel (!%p19_p2) target bundleno = 6 (0x6), region = 93 }
 0x240   :  { %474 = vsyncpa [#allocation3], 1 }
 0x241   :  { %476 = vsyncpa [#allocation3 + $0x1], 1 }
 0x242   :  { %477 = vsyncpa [#allocation6], 1 }
 0x243   :  { %478 = vsyncpa [#allocation4], 1 }
 0x244   :  { %480 = vsyncpa [#allocation4 + $0x1], 1 }

</bundles_post_ra>
